<compile_context>
chip_gen: v6e
topology: v6e:2x2x1
jax: 0.10.0
libtpu: 0.0.40
codegen_flags: <defaults>
</compile_context>

<pallas_src>
import jax
import jax.numpy as jnp
from jax.experimental import pallas as pl
from jax.experimental.pallas import tpu as pltpu


def aconc_kernel(x_ref, params_ref, o_ref):
    # Elementwise VPU/EUP math; params broadcast (tc, P) -> (bn, tc, tl),
    # where P is 1 (per-channel path) or tl (lane-dense collapsed path).
    x = x_ref[...].astype(jnp.float32)            # (bn, tc, tl)
    params = params_ref[...].astype(jnp.float32)  # (3, tc, P)
    p1 = params[0]
    p2 = params[1]
    beta = params[2]

    p2x = p2 * x                                  # computed once, reused twice
    dpx = p1 * x - p2x                            # == p1*x - p2*x bit-exactly
    z = beta * dpx
    # Exact sigmoid: exp runs on the EUP slot and the divide is free at this
    # arithmetic intensity (kernel is HBM-bound with >=2x slack on all slots).
    sig = 1.0 / (1.0 + jnp.exp(-z))
    o_ref[...] = (dpx * sig + p2x).astype(o_ref.dtype)


def _target_block_bytes():
    """Generation-aware per-block byte budget for x / out blocks."""
    # Scoped-VMEM defaults: v5e 16 MiB, v6e 32 MiB, v7x 32 MiB (64 MiB phys).
    # Budget = scoped default minus headroom, divided by ~4 for the
    # double-buffered input blocks + double-buffered output blocks.
    kind = ""
    try:
        kind = jax.devices()[0].device_kind.lower()
    except Exception:
        pass
    if "v7" in kind or "7x" in kind:
        total = 28 * 1024 * 1024   # v7x: keep headroom under 64 MiB physical
    elif "v6" in kind or "6e" in kind:
        total = 30 * 1024 * 1024   # v6e: 32 MiB scoped default
    else:
        total = 14 * 1024 * 1024   # v5e / unknown: 16 MiB scoped default
    try:
        # Never plan more than half the physical VMEM on any generation.
        total = min(total, pltpu.get_tpu_info().vmem_capacity_bytes // 2)
    except Exception:
        pass
    return max(512 * 1024, total // 4)


def _pick_blocks(N, C, L, itemsize, block_bytes):
    """Pick (bn, tc, tl): the biggest (8,128)-aligned, lane-dense block that
    fits `block_bytes`, then shrunk (bn first) so arrays large enough for
    per-step overhead / pipeline edges to matter keep >= 8 grid steps."""
    # Length tile: full L unless a minimal-height slab overflows the budget.
    sub = min(C, 8)
    if sub * L * itemsize <= block_bytes or L <= 128:
        tl = L
    else:
        tl = max(128, ((block_bytes // (sub * itemsize)) // 128) * 128)
    # Channel tile: full C unless one batch row still overflows the budget.
    if C * tl * itemsize <= block_bytes or C <= 8:
        tc = C
    else:
        tc = max(8, ((block_bytes // (tl * itemsize)) // 8) * 8)
    # Cap tc so the three lane-broadcast (tc, 1) params stay vreg-resident.
    if tc > 256:
        tc = 256
    # Batch rows per block fill the rest of the budget.
    bn = max(1, min(N, block_bytes // max(1, tc * tl * itemsize)))

    # Keep >= 8 total grid steps (>= 4 per TensorCore on v7x) when the array
    # is larger than a few MiB; a single-block-sized array stays one step.
    if N * C * L * itemsize > 4 * 1024 * 1024:
        def steps():
            return pl.cdiv(N, bn) * pl.cdiv(C, tc) * pl.cdiv(L, tl)
        while steps() < 8:
            if bn > 1:
                bn = max(1, bn // 2)
            elif tl > 128:
                tl = max(128, ((tl // 2) // 128) * 128)
            elif tc > 8:
                tc = max(8, ((tc // 2) // 8) * 8)
            else:
                break
    return bn, tc, tl


def aconc(x, p1, p2, beta, *, target_block_bytes=None):
    """AconC forward.  x: (N, C, L); p1/p2/beta: (1, C, 1).  Returns (N, C, L)."""
    N, C, L = x.shape
    itemsize = x.dtype.itemsize
    if target_block_bytes is None:
        target_block_bytes = _target_block_bytes()

    # Single stacked (3, C, 1) parameter tensor -> one param DMA per grid step.
    # Kept in f32 so bf16 x I/O does not degrade the per-channel parameters.
    params = jnp.concatenate([p1, p2, beta], axis=0).astype(jnp.float32)

    # Lane-dense fallback: an output last dim < 128 lowers to masked vst.msk
    # partial stores.  Collapse (C, L) into one trailing axis and pre-broadcast
    # the params to match.
    collapse = L < 128
    if collapse:
        x_e = x.reshape(N, 1, C * L)
        params_e = jnp.broadcast_to(params, (3, C, L)).reshape(3, 1, C * L)
    else:
        x_e = x
        params_e = params
    Ne, Ce, Le = x_e.shape

    bn, tc, tl = _pick_blocks(Ne, Ce, Le, itemsize, target_block_bytes)
    grid = (pl.cdiv(Ne, bn), pl.cdiv(Ce, tc), pl.cdiv(Le, tl))

    x_spec = pl.BlockSpec((bn, tc, tl), lambda n, c, l: (n, c, l))
    out_spec = pl.BlockSpec((bn, tc, tl), lambda n, c, l: (n, c, l))
    if params_e.shape[-1] == 1:
        # Per-channel params: broadcast along lanes inside the kernel.
        p_spec = pl.BlockSpec((3, tc, 1), lambda n, c, l: (0, c, 0))
    else:
        # Pre-broadcast lane-dense params (collapsed path).
        p_spec = pl.BlockSpec((3, tc, tl), lambda n, c, l: (0, c, l))

    out = pl.pallas_call(
        aconc_kernel,
        out_shape=jax.ShapeDtypeStruct((Ne, Ce, Le), x.dtype),
        grid_spec=pltpu.PrefetchScalarGridSpec(
            num_scalar_prefetch=0,
            grid=grid,
            in_specs=[x_spec, p_spec],
            out_specs=out_spec,
        ),
        compiler_params=pltpu.CompilerParams(
            dimension_semantics=("parallel", "parallel", "parallel"),
        ),
    )(x_e, params_e)

    return out.reshape(N, C, L) if collapse else out


def aconc_ref(x, p1, p2, beta):
    dpx = p1 * x - p2 * x
    return dpx * jax.nn.sigmoid(beta * dpx) + p2 * x


if __name__ == "__main__":
    key = jax.random.PRNGKey(0)
    k_x1, k_x2, k_p1, k_p2 = jax.random.split(key, 4)

    # Mirrors nn.Parameter(torch.randn(1, width, 1)) / torch.ones(1, width, 1).
    C = 8
    p1 = jax.random.normal(k_p1, (1, C, 1), dtype=jnp.float32)
    p2 = jax.random.normal(k_p2, (1, C, 1), dtype=jnp.float32)
    beta = jnp.ones((1, C, 1), dtype=jnp.float32)

    # Case 1: lane-dense layout (L >= 128), the standard path.
    N, L = 4, 128
    x = jax.random.normal(k_x1, (N, C, L), dtype=jnp.float32)
    out = jax.block_until_ready(aconc(x, p1, p2, beta))
    expected = aconc_ref(x, p1, p2, beta)
    assert out.shape == (N, C, L) and out.dtype == x.dtype
    assert jnp.allclose(out, expected, atol=1e-5, rtol=1e-5), float(
        jnp.max(jnp.abs(out - expected)))

    # Case 2: small L (< 128) exercises the collapsed lane-dense fallback path.
    N2, L2 = 2, 16
    x2 = jax.random.normal(k_x2, (N2, C, L2), dtype=jnp.float32)
    out2 = jax.block_until_ready(aconc(x2, p1, p2, beta))
    expected2 = aconc_ref(x2, p1, p2, beta)
    assert out2.shape == (N2, C, L2) and out2.dtype == x2.dtype
    assert jnp.allclose(out2, expected2, atol=1e-5, rtol=1e-5), float(
        jnp.max(jnp.abs(out2 - expected2)))

    print("KERNEL_OK")
</pallas_src>

<mosaic_0001>
module attributes {stable_mosaic.version = 11 : i64} {
  func.func @aconc_kernel(%arg0: i32, %arg1: i32, %arg2: i32, %arg3: memref<4x8x128xf32, #tpu.memory_space<vmem>>, %arg4: memref<3x8x1xf32, #tpu.memory_space<vmem>>, %arg5: memref<4x8x128xf32, #tpu.memory_space<vmem>>) attributes {dimension_semantics = [#tpu.dimension_semantics<parallel>, #tpu.dimension_semantics<parallel>, #tpu.dimension_semantics<parallel>], iteration_bounds = array<i64: 1, 1, 1>, scalar_prefetch = 0 : i64, scratch_operands = 0 : i64, tpu.core_type = #tpu.core_type<tc>, window_params = [{transform_indices = @transform_0, window_bounds = array<i64: 4, 8, 128>}, {transform_indices = @transform_1, window_bounds = array<i64: 3, 8, 1>}, {transform_indices = @transform_2, window_bounds = array<i64: 4, 8, 128>}]} {
    %c0 = arith.constant 0 : index
    %c0_0 = arith.constant 0 : index
    %c0_1 = arith.constant 0 : index
    %0 = vector.load %arg3[%c0, %c0_0, %c0_1] : memref<4x8x128xf32, #tpu.memory_space<vmem>>, vector<4x8x128xf32>
    %c0_2 = arith.constant 0 : index
    %c0_3 = arith.constant 0 : index
    %c0_4 = arith.constant 0 : index
    %1 = vector.load %arg4[%c0_2, %c0_3, %c0_4] : memref<3x8x1xf32, #tpu.memory_space<vmem>>, vector<3x8x1xf32>
    %2 = vector.extract_strided_slice %1 {offsets = [0, 0, 0], sizes = [1, 8, 1], strides = [1, 1, 1]} : vector<3x8x1xf32> to vector<1x8x1xf32>
    %3 = vector.shape_cast %2 : vector<1x8x1xf32> to vector<8x1xf32>
    %4 = vector.extract_strided_slice %1 {offsets = [1, 0, 0], sizes = [1, 8, 1], strides = [1, 1, 1]} : vector<3x8x1xf32> to vector<1x8x1xf32>
    %5 = vector.shape_cast %4 : vector<1x8x1xf32> to vector<8x1xf32>
    %6 = vector.extract_strided_slice %1 {offsets = [2, 0, 0], sizes = [1, 8, 1], strides = [1, 1, 1]} : vector<3x8x1xf32> to vector<1x8x1xf32>
    %7 = vector.shape_cast %6 : vector<1x8x1xf32> to vector<8x1xf32>
    %8 = vector.shape_cast %5 : vector<8x1xf32> to vector<1x8x1xf32>
    %9 = vector.broadcast %8 : vector<1x8x1xf32> to vector<4x8x128xf32>
    %10 = arith.mulf %9, %0 : vector<4x8x128xf32>
    %11 = vector.shape_cast %3 : vector<8x1xf32> to vector<1x8x1xf32>
    %12 = vector.broadcast %11 : vector<1x8x1xf32> to vector<4x8x128xf32>
    %13 = arith.mulf %12, %0 : vector<4x8x128xf32>
    %14 = arith.subf %13, %10 : vector<4x8x128xf32>
    %15 = vector.shape_cast %7 : vector<8x1xf32> to vector<1x8x1xf32>
    %16 = vector.broadcast %15 : vector<1x8x1xf32> to vector<4x8x128xf32>
    %17 = arith.mulf %16, %14 : vector<4x8x128xf32>
    %cst = arith.constant 0.000000e+00 : f32
    %18 = vector.broadcast %cst : f32 to vector<4x8x128xf32>
    %19 = arith.subf %18, %17 : vector<4x8x128xf32>
    %20 = math.exp %19 : vector<4x8x128xf32>
    %cst_5 = arith.constant 1.000000e+00 : f32
    %21 = vector.broadcast %cst_5 : f32 to vector<4x8x128xf32>
    %22 = arith.addf %21, %20 : vector<4x8x128xf32>
    %cst_6 = arith.constant 1.000000e+00 : f32
    %23 = vector.broadcast %cst_6 : f32 to vector<4x8x128xf32>
    %24 = arith.divf %23, %22 : vector<4x8x128xf32>
    %25 = arith.mulf %14, %24 : vector<4x8x128xf32>
    %26 = arith.addf %25, %10 : vector<4x8x128xf32>
    %c0_7 = arith.constant 0 : index
    %c0_8 = arith.constant 0 : index
    %c0_9 = arith.constant 0 : index
    %27 = vector.load %arg5[%c0_7, %c0_8, %c0_9] : memref<4x8x128xf32, #tpu.memory_space<vmem>>, vector<4x8x128xf32>
    tpu.vector_store %arg5[%c0_7, %c0_8, %c0_9], %26 {strides = array<i32>} : memref<4x8x128xf32, #tpu.memory_space<vmem>>, vector<4x8x128xf32>,
    return
  }
  func.func @transform_0(%arg0: i32, %arg1: i32, %arg2: i32) -> (i32, i32, i32) {
    %c0_i32 = arith.constant 0 : i32
    return %arg0, %arg1, %arg2 : i32, i32, i32
  }
  func.func @transform_1(%arg0: i32, %arg1: i32, %arg2: i32) -> (i32, i32, i32) {
    %c0_i32 = arith.constant 0 : i32
    %c0_i32_0 = arith.constant 0 : i32
    %c0_i32_1 = arith.constant 0 : i32
    return %c0_i32, %arg1, %c0_i32_0 : i32, i32, i32
  }
  func.func @transform_2(%arg0: i32, %arg1: i32, %arg2: i32) -> (i32, i32, i32) {
    %c0_i32 = arith.constant 0 : i32
    return %arg0, %arg1, %arg2 : i32, i32, i32
  }
}

</mosaic_0001>

<bundles_post_ra>
// kernel: tpu_custom_call.1
= control target key start
LH: loop header
LB: loop body
LE: loop exit
PB: predicated region body
PF: predicated region fallthrough
CT: control target
= control target key end

     0   :  { %7 = vsyncpa [#allocation3], 0  ;;  %s225_s0 = inlined_call_operand.hbm [shape: f32[4,8,128], index: 0, kind: input, shape index: {}]   ;;  %s226_s1 = inlined_call_operand.vmem [shape: f32[3,8,1], index: 1, kind: input, shape index: {}]   ;;  %s227_s2 = inlined_call_operand.hbm [shape: f32[4,8,128], index: 2, kind: output, shape index: {}]  }
   0x1   :  { %8 = vsyncpa [#allocation4], 0  ;;  %s184_s9 = smov [#allocation2]  }
   0x2   :  { %s14_s10 = sshll.u32 %s184_s9, 4  ;;  %s15_s10 = int_to_ptr.vmem [resolvable:$true] %s14_s10 }
   0x3   :  { %s148_s11 = scalar_lea.vmem %s15_s10, 512  ;;  %p153_p1 = scmp.lt.s32.totalorder %s15_s10, %s15_s10 }
   0x4   :  { %p149_p0 = scmp.ne.s32.totalorder %s15_s10, %s148_s11  ;;  %p154_p2 = scmp.lt.s32.totalorder %s148_s11, %s148_s11 }
   0x6   :  { %p155_p3 = por %p154_p2, %p153_p1 }
   0x8   :  { %p156_p4 = pnand %p155_p3, %p149_p0 }
   0xa   :  { %159 = shalt.err (!%p156_p4)
}
   0xb   :  { %s185_s12 = smov 128   ;;  %s186_s13 = smov 8  }
   0xc   :  { %20 = dma.hbm_to_vmem [thread:$0]  %s225_s0, 512, %s15_s10, [#allocation3], %s185_s12, %s185_s12, %s186_s13  }
   0xd   :  { %180 = dma.done.wait [#allocation3], 512  }
   0xe   :  { %181 = vsyncadd [#allocation3], 4294966784  ;;  %v187_v0 = vmov 0   ;;  %v31_v1 = vld [vmem:[%s226_s1 + $0x8] sm:$0xff]  ;;  %v32_v2 = vld [vmem:[%s226_s1 + $0x10] sm:$0xff]  ;;  %s188_s0 = smov [#allocation5]  }
   0xf   :  { %122 = vset.pattern.permute.xlu0 %v187_v0  ;;  %123 = vset.pattern.permute.xlu1 %v187_v0  ;;  %v30_v3 = vld [vmem:[%s226_s1] sm:$0xff]  ;;  %v27_v6 = vld [vmem:[#allocation2 + $0x8] sm:$0xff]  ;;  %v28_v7 = vld [vmem:[#allocation2 + $0x10] sm:$0xff]  ;;  %s105_s1 = sshll.u32 %s188_s0, 4  ;;  %s106_s1 = int_to_ptr.vmem [resolvable:$true] %s105_s1 }
  0x10   :  { %35 = vperm.xlu0 %122, %v31_v1   ;;  %57 = vperm.xlu1 %123, %v32_v2   ;;  %v26_v5 = vld [vmem:[#allocation2] sm:$0xff]  ;;  %v29_v8 = vld [vmem:[#allocation2 + $0x18] sm:$0xff]  ;;  %s160_s22 = scalar_lea.vmem %s106_s1, 512  ;;  %p165_p6 = scmp.lt.s32.totalorder %s106_s1, %s106_s1 }
  0x11   :  { %p161_p5 = scmp.ne.s32.totalorder %s106_s1, %s160_s22  ;;  %p166_p7 = scmp.lt.s32.totalorder %s160_s22, %s160_s22 }
  0x13   :  { %p167_p8 = por %p166_p7, %p165_p6 }
  0x14   :  { %44 = vperm.xlu0 %122, %v30_v3  }
  0x15   :  { %p168_p9 = pnand %p167_p8, %p161_p5 }
  0x8b   :  { %v36_v4 = vpop.permute.xlu0 %35  ;;  %v58_v18 = vpop.permute.xlu1 %57 }
  0x8c   :  { %v38_v10 = vmul.f32 %v36_v4, %v26_v5  ;;  %v39_v11 = vmul.f32 %v36_v4, %v27_v6  ;;  %v40_v12 = vmul.f32 %v36_v4, %v28_v7  ;;  %v41_v13 = vmul.f32 %v36_v4, %v29_v8 }
  0x8f   :  { %v45_v9 = vpop.permute.xlu0 %44 }
  0x90   :  { %v47_v14 = vmul.f32 %v45_v9, %v26_v5  ;;  %v48_v15 = vmul.f32 %v45_v9, %v27_v6  ;;  %v49_v16 = vmul.f32 %v45_v9, %v28_v7  ;;  %v50_v17 = vmul.f32 %v45_v9, %v29_v8 }
  0x92   :  { %v51_v19 = vsub.f32 %v47_v14, %v38_v10  ;;  %v52_v20 = vsub.f32 %v48_v15, %v39_v11  ;;  %v53_v21 = vsub.f32 %v49_v16, %v40_v12  ;;  %v54_v22 = vsub.f32 %v50_v17, %v41_v13 }
  0x94   :  { %v60_v23 = vmul.f32 %v58_v18, %v51_v19  ;;  %v61_v24 = vmul.f32 %v58_v18, %v52_v20  ;;  %v62_v25 = vmul.f32 %v58_v18, %v53_v21  ;;  %v63_v26 = vmul.f32 %v58_v18, %v54_v22 }
  0x96   :  { %v64_v27 = vsub.f32 0.0, %v60_v23  ;;  %v65_v28 = vsub.f32 0.0, %v61_v24  ;;  %v66_v29 = vsub.f32 0.0, %v62_v25  ;;  %v67_v30 = vsub.f32 0.0, %v63_v26 }
  0x98   :  { %v68_v31 = vmul.f32 1.442695, %v64_v27  ;;  %v70_v32 = vmul.f32 1.442695, %v65_v28  ;;  %v72_v33 = vmul.f32 1.442695, %v66_v29 }
  0x99   :  { %v74_v34 = vmul.f32 1.442695, %v67_v30 }
  0x9a   :  { %124 = vpow2.f32 %v68_v31 }
  0x9b   :  { %126 = vpow2.f32 %v70_v32 }
  0x9c   :  { %128 = vpow2.f32 %v72_v33 }
  0x9d   :  { %130 = vpow2.f32 %v74_v34 }
  0xa7   :  { %v125_v35 = vpop.eup %124 }
  0xa8   :  { %v127_v36 = vpop.eup %126  ;;  %v76_v37 = vadd.f32 1.0, %v125_v35 }
  0xa9   :  { %v129_v38 = vpop.eup %128  ;;  %v77_v39 = vadd.f32 1.0, %v127_v36 }
  0xaa   :  { %v131_v40 = vpop.eup %130  ;;  %v78_v41 = vadd.f32 1.0, %v129_v38  ;;  %132 = vrcp.f32 %v76_v37 }
  0xab   :  { %v79_v42 = vadd.f32 1.0, %v131_v40  ;;  %134 = vrcp.f32 %v77_v39 }
  0xac   :  { %136 = vrcp.f32 %v78_v41 }
  0xad   :  { %138 = vrcp.f32 %v79_v42 }
  0xb7   :  { %v133_v43 = vpop.eup %132 }
  0xb8   :  { %v135_v44 = vpop.eup %134  ;;  %v88_v45 = vmul.f32 %v133_v43, %v51_v19 }
  0xb9   :  { %v137_v46 = vpop.eup %136  ;;  %v89_v47 = vmul.f32 %v135_v44, %v52_v20 }
  0xba   :  { %v139_v48 = vpop.eup %138  ;;  %v90_v49 = vmul.f32 %v137_v46, %v53_v21  ;;  %v92_v50 = vadd.f32 %v88_v45, %v38_v10 }
  0xbb   :  { %v91_v51 = vmul.f32 %v139_v48, %v54_v22  ;;  %v93_v52 = vadd.f32 %v89_v47, %v39_v11 }
  0xbc   :  { %v94_v53 = vadd.f32 %v90_v49, %v40_v12  ;;  %96 = vst [vmem:[#allocation5] sm:$0xff] %v92_v50 }
  0xbd   :  { %v95_v54 = vadd.f32 %v91_v51, %v41_v13  ;;  %97 = vst [vmem:[#allocation5 + $0x8] sm:$0xff] %v93_v52 }
  0xbe   :  { %98 = vst [vmem:[#allocation5 + $0x10] sm:$0xff] %v94_v53 }
  0xbf   :  { %99 = vst [vmem:[#allocation5 + $0x18] sm:$0xff] %v95_v54 }
  0xc0   :  { %171 = shalt.err (!%p168_p9)
}
  0xc1   :  { %111 = dma.vmem_to_hbm [thread:$0]  %s106_s1, 512, %s227_s2, [#allocation4], %s185_s12, %s185_s12, %s186_s13  }
  0xc2   :  { %182 = dma.done.wait [#allocation4], 512  }
  0xc3   :  { %183 = vsyncadd [#allocation4], 4294966784 }
  0xc4   :  { %115 = vsyncpa [#allocation3], 1 }
  0xc5   :  { %116 = vsyncpa [#allocation4], 1 }

</bundles_post_ra>
